<compile_context>
chip_gen: v7x
topology: tpu7x:2x2x1
jax: 0.10.0
libtpu: 0.0.40
codegen_flags: <defaults>
</compile_context>

<pallas_src>
import jax
import jax.numpy as jnp
from jax.experimental import pallas as pl
from jax.experimental.pallas import tpu as pltpu

D_IN, D_HID, D_OUT = 50, 50, 10


def _decoder_kernel(x_ref, w1t_ref, b1_ref, w2t_ref, b2_ref, o_ref):
    # Cast to bf16 on the VPU under the DMA (no separate HBM cast pass).
    x = x_ref[...].astype(jnp.bfloat16)                     # [TB, 50]

    # fc1 + ReLU: bf16 MXU inputs, f32 accumulation, f32 bias.
    h = jnp.dot(x, w1t_ref[...], preferred_element_type=jnp.float32)
    h = jnp.maximum(h + b1_ref[...], 0.0)                   # [TB, 50] f32

    # Dropout2d(p=0.2): identity in eval mode.

    # fc2.
    y = jnp.dot(h.astype(jnp.bfloat16), w2t_ref[...],
                preferred_element_type=jnp.float32)
    y = y + b2_ref[...]                                     # [TB, 10] f32

    # Numerically-stable log_softmax over the class axis.  Padded rows of a
    # ragged last tile may produce garbage internally, but stores are masked
    # and log_softmax is per-row, so valid rows are unaffected.
    m = jnp.max(y, axis=1, keepdims=True)
    s = y - m
    lse = jnp.log(jnp.sum(jnp.exp(s), axis=1, keepdims=True))
    o_ref[...] = (s - lse).astype(o_ref.dtype)


def multi_lenet_dec(x, w1, b1, w2, b2, *, tb_max=8192):
    """x: [B, 50] f32.  w1: [50, 50] (out,in), b1: [50], w2: [10, 50] (out,in), b2: [10]."""
    B, d_in = x.shape
    assert d_in == D_IN

    # Batch tile: large multiple of 8 (amortizes ~0.35 us/step overhead).
    # For small B, split into >= 2 tiles so the "parallel" batch axis can span
    # both TensorCores on v7x.
    if B > tb_max:
        tb = tb_max
    else:
        tb = 8 * pl.cdiv(pl.cdiv(B, 2), 8)
        if tb >= B or B < 16:
            tb = B                       # single full-array block (always legal)
    grid = (pl.cdiv(B, tb),)

    # One-time tiny host transposes to [in, out] + bf16 for the MXU.
    w1t = w1.T.astype(jnp.bfloat16)                          # [50, 50]
    w2t = w2.T.astype(jnp.bfloat16)                          # [50, 10]
    b1_r = b1.reshape(1, D_HID).astype(jnp.float32)
    b2_r = b2.reshape(1, D_OUT).astype(jnp.float32)

    cost = pl.CostEstimate(
        flops=2 * B * (D_IN * D_HID + D_HID * D_OUT),
        transcendentals=B * D_OUT + B,                       # exp + log per row
        bytes_accessed=(B * D_IN * 4 + B * D_OUT * 4         # x (f32) + out (f32)
                        + D_IN * D_HID * 2 + D_HID * D_OUT * 2
                        + D_HID * 4 + D_OUT * 4),
    )

    return pl.pallas_call(
        _decoder_kernel,
        out_shape=jax.ShapeDtypeStruct((B, D_OUT), jnp.float32),
        grid=grid,
        in_specs=[
            pl.BlockSpec((tb, D_IN), lambda i: (i, 0)),       # x: streamed per tile
            pl.BlockSpec((D_IN, D_HID), lambda i: (0, 0)),    # w1^T: resident
            pl.BlockSpec((1, D_HID), lambda i: (0, 0)),       # b1: resident
            pl.BlockSpec((D_HID, D_OUT), lambda i: (0, 0)),   # w2^T: resident
            pl.BlockSpec((1, D_OUT), lambda i: (0, 0)),       # b2: resident
        ],
        out_specs=pl.BlockSpec((tb, D_OUT), lambda i: (i, 0)),
        compiler_params=pltpu.CompilerParams(
            dimension_semantics=("parallel",),                # megacore on v7x
            # Large tiles exceed v5e's 16 MiB default scoped VMEM; stay well
            # under v7x's 64 MiB physical VMEM.
            vmem_limit_bytes=48 * 1024 * 1024,
        ),
        cost_estimate=cost,
    )(x, w1t, b1_r, w2t, b2_r)


def _reference(x, w1, b1, w2, b2):
    h = jnp.maximum(x @ w1.T + b1, 0.0)
    y = h @ w2.T + b2
    return jax.nn.log_softmax(y, axis=1)


if __name__ == "__main__":
    key = jax.random.PRNGKey(0)
    k_x, k_w1, k_b1, k_w2, k_b2 = jax.random.split(key, 5)

    B = 64  # small test batch; the kernel tiles arbitrarily large B too
    x = jax.random.normal(k_x, (B, 50), dtype=jnp.float32)

    # Deterministic parameter init (Kaiming-uniform-ish bounds like nn.Linear).
    bound1 = 1.0 / jnp.sqrt(50.0)
    w1 = jax.random.uniform(k_w1, (50, 50), minval=-bound1, maxval=bound1, dtype=jnp.float32)
    b1 = jax.random.uniform(k_b1, (50,), minval=-bound1, maxval=bound1, dtype=jnp.float32)
    w2 = jax.random.uniform(k_w2, (10, 50), minval=-bound1, maxval=bound1, dtype=jnp.float32)
    b2 = jax.random.uniform(k_b2, (10,), minval=-bound1, maxval=bound1, dtype=jnp.float32)

    out = multi_lenet_dec(x, w1, b1, w2, b2)
    out = jax.block_until_ready(out)

    ref = _reference(x, w1, b1, w2, b2)
    assert out.shape == (B, 10)
    # bf16 MXU inputs -> loosened tolerance vs the f32 reference.
    assert jnp.allclose(out, ref, atol=5e-2, rtol=5e-2), "mismatch vs reference"

    print("KERNEL_OK")
</pallas_src>

<mosaic_0001>
module attributes {stable_mosaic.version = 11 : i64} {
  func.func @_decoder_kernel(%arg0: i32, %arg1: memref<32x50xf32, #tpu.memory_space<vmem>>, %arg2: memref<50x50xbf16, #tpu.memory_space<vmem>>, %arg3: memref<1x50xf32, #tpu.memory_space<vmem>>, %arg4: memref<50x10xbf16, #tpu.memory_space<vmem>>, %arg5: memref<1x10xf32, #tpu.memory_space<vmem>>, %arg6: memref<32x10xf32, #tpu.memory_space<vmem>>) attributes {dimension_semantics = [#tpu.dimension_semantics<parallel>], iteration_bounds = array<i64: 2>, scalar_prefetch = 0 : i64, scratch_operands = 0 : i64, tpu.core_type = #tpu.core_type<tc>, window_params = [{transform_indices = @transform_0, window_bounds = array<i64: 32, 50>}, {pipeline_mode = #tpu.pipeline_mode<synchronous>, transform_indices = @transform_1, window_bounds = array<i64: 50, 50>}, {pipeline_mode = #tpu.pipeline_mode<synchronous>, transform_indices = @transform_2, window_bounds = array<i64: 1, 50>}, {pipeline_mode = #tpu.pipeline_mode<synchronous>, transform_indices = @transform_3, window_bounds = array<i64: 50, 10>}, {pipeline_mode = #tpu.pipeline_mode<synchronous>, transform_indices = @transform_4, window_bounds = array<i64: 1, 10>}, {transform_indices = @transform_5, window_bounds = array<i64: 32, 10>}]} {
    %c0 = arith.constant 0 : index
    %c0_0 = arith.constant 0 : index
    %0 = vector.load %arg1[%c0, %c0_0] : memref<32x50xf32, #tpu.memory_space<vmem>>, vector<32x50xf32>
    %1 = arith.truncf %0 : vector<32x50xf32> to vector<32x50xbf16>
    %c0_1 = arith.constant 0 : index
    %c0_2 = arith.constant 0 : index
    %2 = vector.load %arg2[%c0_1, %c0_2] : memref<50x50xbf16, #tpu.memory_space<vmem>>, vector<50x50xbf16>
    %cst = arith.constant dense<0.000000e+00> : vector<32x50xf32>
    %3 = tpu.matmul %1, %2, %cst {dimension_numbers = #tpu.dot_dimension_numbers<[1], [0], [0], [1], [0, 0, 1, 1], [], []>} : vector<32x50xbf16>, vector<50x50xbf16>, vector<32x50xf32> -> vector<32x50xf32>
    %c0_3 = arith.constant 0 : index
    %c0_4 = arith.constant 0 : index
    %4 = vector.load %arg3[%c0_3, %c0_4] : memref<1x50xf32, #tpu.memory_space<vmem>>, vector<1x50xf32>
    %5 = vector.broadcast %4 : vector<1x50xf32> to vector<32x50xf32>
    %6 = arith.addf %3, %5 : vector<32x50xf32>
    %cst_5 = arith.constant 0.000000e+00 : f32
    %7 = vector.broadcast %cst_5 : f32 to vector<32x50xf32>
    %8 = arith.maximumf %6, %7 : vector<32x50xf32>
    %9 = arith.truncf %8 : vector<32x50xf32> to vector<32x50xbf16>
    %c0_6 = arith.constant 0 : index
    %c0_7 = arith.constant 0 : index
    %10 = vector.load %arg4[%c0_6, %c0_7] : memref<50x10xbf16, #tpu.memory_space<vmem>>, vector<50x10xbf16>
    %cst_8 = arith.constant dense<0.000000e+00> : vector<32x10xf32>
    %11 = tpu.matmul %9, %10, %cst_8 {dimension_numbers = #tpu.dot_dimension_numbers<[1], [0], [0], [1], [0, 0, 1, 1], [], []>} : vector<32x50xbf16>, vector<50x10xbf16>, vector<32x10xf32> -> vector<32x10xf32>
    %c0_9 = arith.constant 0 : index
    %c0_10 = arith.constant 0 : index
    %12 = vector.load %arg5[%c0_9, %c0_10] : memref<1x10xf32, #tpu.memory_space<vmem>>, vector<1x10xf32>
    %13 = vector.broadcast %12 : vector<1x10xf32> to vector<32x10xf32>
    %14 = arith.addf %11, %13 : vector<32x10xf32>
    %cst_11 = arith.constant dense<0xFF800000> : vector<32xf32>
    %15 = vector.multi_reduction <maximumf>, %14, %cst_11 [1] : vector<32x10xf32> to vector<32xf32>
    %16 = vector.shape_cast %15 : vector<32xf32> to vector<32x1xf32>
    %17 = vector.broadcast %16 : vector<32x1xf32> to vector<32x10xf32>
    %18 = arith.subf %14, %17 : vector<32x10xf32>
    %19 = math.exp %18 : vector<32x10xf32>
    %cst_12 = arith.constant dense<0.000000e+00> : vector<32xf32>
    %20 = vector.multi_reduction <add>, %19, %cst_12 [1] : vector<32x10xf32> to vector<32xf32>
    %21 = vector.shape_cast %20 : vector<32xf32> to vector<32x1xf32>
    %22 = math.log %21 : vector<32x1xf32>
    %23 = vector.broadcast %22 : vector<32x1xf32> to vector<32x10xf32>
    %24 = arith.subf %18, %23 : vector<32x10xf32>
    %c0_13 = arith.constant 0 : index
    %c0_14 = arith.constant 0 : index
    %25 = vector.load %arg6[%c0_13, %c0_14] : memref<32x10xf32, #tpu.memory_space<vmem>>, vector<32x10xf32>
    tpu.vector_store %arg6[%c0_13, %c0_14], %24 {strides = array<i32>} : memref<32x10xf32, #tpu.memory_space<vmem>>, vector<32x10xf32>,
    return
  }
  func.func @transform_0(%arg0: i32) -> (i32, i32) {
    %c0_i32 = arith.constant 0 : i32
    %c0_i32_0 = arith.constant 0 : i32
    return %arg0, %c0_i32 : i32, i32
  }
  func.func @transform_1(%arg0: i32) -> (i32, i32) {
    %c0_i32 = arith.constant 0 : i32
    %c0_i32_0 = arith.constant 0 : i32
    %c0_i32_1 = arith.constant 0 : i32
    return %c0_i32, %c0_i32_0 : i32, i32
  }
  func.func @transform_2(%arg0: i32) -> (i32, i32) {
    %c0_i32 = arith.constant 0 : i32
    %c0_i32_0 = arith.constant 0 : i32
    %c0_i32_1 = arith.constant 0 : i32
    return %c0_i32, %c0_i32_0 : i32, i32
  }
  func.func @transform_3(%arg0: i32) -> (i32, i32) {
    %c0_i32 = arith.constant 0 : i32
    %c0_i32_0 = arith.constant 0 : i32
    %c0_i32_1 = arith.constant 0 : i32
    return %c0_i32, %c0_i32_0 : i32, i32
  }
  func.func @transform_4(%arg0: i32) -> (i32, i32) {
    %c0_i32 = arith.constant 0 : i32
    %c0_i32_0 = arith.constant 0 : i32
    %c0_i32_1 = arith.constant 0 : i32
    return %c0_i32, %c0_i32_0 : i32, i32
  }
  func.func @transform_5(%arg0: i32) -> (i32, i32) {
    %c0_i32 = arith.constant 0 : i32
    %c0_i32_0 = arith.constant 0 : i32
    return %arg0, %c0_i32 : i32, i32
  }
}

</mosaic_0001>

<bundles_post_ra>
// kernel: tpu_custom_call.1
= control target key start
LH: loop header
LB: loop body
LE: loop exit
PB: predicated region body
PF: predicated region fallthrough
CT: control target
= control target key end

     0   :  { %s671_s18 = smov 0   ;;  %s745_s0 = inlined_call_operand.vmem [shape: f32[64,50], index: 0, kind: input, shape index: {}]   ;;  %s746_s1 = inlined_call_operand.vmem [shape: bf16[50,50], index: 1, kind: input, shape index: {}]   ;;  %s747_s2 = inlined_call_operand.vmem [shape: f32[1,50], index: 2, kind: input, shape index: {}]   ;;  %s748_s3 = inlined_call_operand.vmem [shape: bf16[50,10], index: 3, kind: input, shape index: {}]   ;;  %s749_s4 = inlined_call_operand.vmem [shape: f32[1,10], index: 4, kind: input, shape index: {}]   ;;  %s750_s5 = inlined_call_operand.vmem [shape: f32[64,10], index: 5, kind: output, shape index: {}]  }
   0x1 LB: > { %s538_s19 = sadd.s32 4294967295, %s639_s18   ;;  %p542_p0 = scmp.ge.s32.totalorder %s639_s18, 1  ;;  %s639_s18 = sphi %s671_s18, %s15_s18  }
   0x2   : > { %p188_p1 = scmp.lt.s32.totalorder %s639_s18, 3 }
   0x4   : > { %p189_p2 = pnand %p542_p0, %p188_p1 }
   0x5   : > { %v609_v0 = vld [vmem:[%s746_s1] sm:$0xff] (!%p189_p2)   ;;  %v610_v1 = vld [vmem:[%s746_s1 + $0x8] sm:$0xff] (!%p189_p2)   ;;  %s543_s24 = sshll.u32 (!%p189_p2), %s538_s19, 2  ;;  %v611_v2 = vld [vmem:[%s746_s1 + $0x10] sm:$0xff] (!%p189_p2)   ;;  %vm270_vm0 = vcmask (!%p189_p2), 408576   ;;  %vm277_vm1 = vcmask (!%p189_p2), 1040384  }
   0x6   : > { %192 = sbr.rel (%p189_p2) target bundleno = 784 (0x310), region = 40  ;;  %575 = vmatprep.subr.bf16.mxu0 (!%p189_p2), %v609_v0  ;;  %p217_p3 = scmp.lt.s32.totalorder (!%p189_p2), %s543_s24, 7  ;;  %v613_v3 = vld [vmem:[%s748_s3] sm:$0xff] (!%p189_p2)   ;;  %v614_v4 = vld [vmem:[%s748_s3 + $0x8] sm:$0xff] (!%p189_p2)   ;;  %v615_v13 = vld [vmem:[%s748_s3 + $0x10] sm:$0xff] (!%p189_p2)   ;;  %vm429_vm2 = vcmask (!%p189_p2), 80896  }
   0x7   : > { %576 = vmatpush3.bf16.msra.mxu0 (!%p189_p2), %v609_v0  ;;  %587 = vmatprep.subr.bf16.mxu1 (!%p189_p2), %v613_v3  ;;  %v612_v5 = vld [vmem:[%s746_s1 + $0x18] ss:$0 sps:$4 sm:$0x11] (!%p189_p2)   ;;  %v547_v16 = vld [vmem:[%s747_s2] ss:$0 sm:$0xff] (!%p189_p2) }
   0x8   : > { %577 = vmatprep.subr.bf16.mxu0 (!%p189_p2), %v610_v1  ;;  %588 = vmatpush3.bf16.msra.mxu1 (!%p189_p2), %v613_v3  ;;  %v279_v11 = vsel (!%p189_p2), %vm277_vm1, %v612_v5, 0  ;;  %v616_v14 = vld [vmem:[%s748_s3 + $0x18] ss:$0 sps:$4 sm:$0x11] (!%p189_p2)   ;;  %v554_v31 = vld [vmem:[%s749_s4] ss:$0 sm:$0xff] (!%p189_p2) }
   0x9   : > { %589 = vmatprep.subr.bf16.mxu1 (!%p189_p2), %v614_v4  ;;  %v378_v15 = vsel (!%p189_p2), %vm277_vm1, %v616_v14, 0 }
   0xb   : > { %578 = vmatpush3.bf16.msra.mxu0 (!%p189_p2), %v610_v1 }
   0xc   : > { %579 = vmatprep.subr.bf16.mxu0 (!%p189_p2), %v611_v2  ;;  %590 = vmatpush3.bf16.msra.mxu1 (!%p189_p2), %v614_v4 }
   0xd   : > { %s752_s24 = smov (!%p217_p3, %s543_s24), 7  ;;  %591 = vmatprep.subr.bf16.mxu1 %v615_v13 }
   0xe   : > { %s544_s6 = sshll.u32 %s752_s24, 3 }
   0xf   : > { %s220_s9 = scalar_lea.vmem %s745_s0, %s544_s6  ;;  %580 = vmatpush3.bf16.msra.mxu0 %v611_v2  ;;  %s226_s23 = scalar_lea.vmem %s750_s5, %s544_s6 }
  0x10   : > { %v229_v6 = vld [vmem:[%s220_s9] sm:$0xff]  ;;  %v230_v7 = vld [vmem:[%s220_s9 + $0x8] sm:$0xff]  ;;  %v231_v9 = vld [vmem:[%s220_s9 + $0x10] sm:$0xff]  ;;  %599 = vmatprep.subr.msk.bf16.mxu0 %vm277_vm1, %v612_v5  ;;  %592 = vmatpush3.bf16.msra.mxu1 %v615_v13 }
  0x11   : > { %v233_v8 = vpack.c.bf16 %v230_v7, %v229_v6  ;;  %v232_v10 = vld [vmem:[%s220_s9 + $0x18] sm:$0xff]  ;;  %600 = vmatprep.subr.msk.bf16.mxu1 %vm277_vm1, %v616_v14 }
  0x12   : > { %v234_v12 = vpack.c.bf16 %v232_v10, %v231_v9 }
  0x13   : > { %583 = vmatprep.mubr.msk.bf16.mxu0 %vm270_vm0, %v233_v8  ;;  %582 = vmatpush3.bf16.msra.mxu0 %v279_v11 }
  0x14   : > { %594 = vmatpush3.bf16.msra.mxu1 %v378_v15 }
  0x16   : > { %584 = vmatmul.mubr.msk.bf16.vlgmr.msra.gmra.mrb[0].mxu0 %vm270_vm0, %v234_v12 }
  0xe9   : > { %v585_v17 = vpop.f32.mrb[0].mxu0 }
  0xea   : > { %v324_v18 = vadd.f32 %v585_v17, %v547_v16  ;;  %v315_v19 = vpop.f32.mrb[1].mxu0 }
  0xeb   : > { %v316_v20 = vadd.f32 %v547_v16, %v315_v19  ;;  %v586_v21 = vpop.f32.mrb[2].mxu0 }
  0xec   : > { %v327_v22 = vadd.f32 %v586_v21, %v547_v16  ;;  %v318_v23 = vpop.f32.mrb[3].mxu0  ;;  %v332_v25 = vmax.f32 %v324_v18, 0.0 }
  0xed   : > { %v319_v24 = vadd.f32 %v547_v16, %v318_v23  ;;  %v330_v27 = vmax.f32 %v316_v20, 0.0 }
  0xee   : > { %v333_v26 = vmax.f32 %v327_v22, 0.0 }
  0xef   : > { %v331_v28 = vmax.f32 %v319_v24, 0.0 }
  0xf0   : > { %v335_v29 = vpack.c.bf16 %v333_v26, %v332_v25 }
  0xf1   : > { %v334_v30 = vpack.c.bf16 %v331_v28, %v330_v27 }
  0xf3   : > { %595 = vmatprep.mubr.msk.bf16.mxu1 %vm270_vm0, %v334_v30 }
  0xf4   : > { %596 = vmatmul.mubr.msk.bf16.vlgmr.msra.gmra.mrb[0].mxu1 %vm270_vm0, %v335_v29 }
 0x1c7   : > { %v597_v32 = vpop.f32.mrb[0].mxu1 }
 0x1c8   : > { %v423_v33 = vadd.f32 %v597_v32, %v554_v31  ;;  %v414_v34 = vpop.f32.mrb[1].mxu1 }
 0x1c9   : > { %v415_v35 = vadd.f32 %v554_v31, %v414_v34  ;;  %v598_v36 = vpop.f32.mrb[2].mxu1 }
 0x1ca   : > { %v426_v37 = vadd.f32 %v598_v36, %v554_v31  ;;  %v417_v38 = vpop.f32.mrb[3].mxu1  ;;  %v436_v39 = vsel %vm429_vm2, %v423_v33, -inf }
 0x1cb   : > { %v418_v40 = vadd.f32 %v554_v31, %v417_v38  ;;  %437 = vmax.xlane.f32.xlu1 %v436_v39  ;;  %v430_v41 = vsel %vm429_vm2, %v415_v35, -inf }
 0x1cc   : > { %431 = vmax.xlane.f32.xlu0 %v430_v41  ;;  %v439_v42 = vsel %vm429_vm2, %v426_v37, -inf }
 0x1cd   : > { %v433_v43 = vsel %vm429_vm2, %v418_v40, -inf }
 0x1cf   : > { %440 = vmax.xlane.f32.xlu1 %v439_v42 }
 0x1d0   : > { %434 = vmax.xlane.f32.xlu0 %v433_v43 }
 0x258   : > { %v438_v44 = vpop.xlane.xlu1 %437 }
 0x259   : > { %v444_v45 = vsub.f32 %v423_v33, %v438_v44  ;;  %v432_v46 = vpop.xlane.xlu0 %431 }
 0x25a   : > { %v442_v47 = vsub.f32 %v415_v35, %v432_v46 }
 0x25b   : > { %v450_v48 = vmul.f32 1.442695, %v444_v45 }
 0x25c   : > { %v446_v49 = vmul.f32 1.442695, %v442_v47  ;;  %v441_v50 = vpop.xlane.xlu1 %440 }
 0x25d   : > { %v445_v51 = vsub.f32 %v426_v37, %v441_v50  ;;  %v435_v52 = vpop.xlane.xlu0 %434 }
 0x25e   : > { %617 = vpow2.f32 %v446_v49  ;;  %v443_v53 = vsub.f32 %v418_v40, %v435_v52 }
 0x25f   : > { %619 = vpow2.f32 %v450_v48  ;;  %v452_v54 = vmul.f32 1.442695, %v445_v51 }
 0x260   : > { %v448_v55 = vmul.f32 1.442695, %v443_v53 }
 0x262   : > { %621 = vpow2.f32 %v448_v55 }
 0x263   : > { %623 = vpow2.f32 %v452_v54 }
 0x268   : > { %v618_v56 = vpop.eup %617 }
 0x269   : > { %v454_v57 = vsel %vm429_vm2, %v618_v56, 0.0  ;;  %v620_v58 = vpop.eup %619 }
 0x26a   : > { %455 = vadd.xlane.f32.xlu0 %v454_v57  ;;  %v460_v60 = vsel %vm429_vm2, %v620_v58, 0.0 }
 0x26c   : > { %v622_v59 = vpop.eup %621 }
 0x26d   : > { %v457_v61 = vsel %vm429_vm2, %v622_v59, 0.0  ;;  %v624_v62 = vpop.eup %623 }
 0x26e   : > { %461 = vadd.xlane.f32.xlu0 %v460_v60  ;;  %458 = vadd.xlane.f32.xlu1 %v457_v61  ;;  %v463_v63 = vsel %vm429_vm2, %v624_v62, 0.0 }
 0x272   : > { %464 = vadd.xlane.f32.xlu1 %v463_v63 }
 0x2f7   : > { %v456_v0 = vpop.xlane.xlu0 %455 }
 0x2f8   : > { %625 = vlog2.f32 %v456_v0 }
 0x2fb   : > { %v459_v1 = vpop.xlane.xlu1 %458  ;;  %v462_v2 = vpop.xlane.xlu0 %461 }
 0x2fc   : > { %627 = vlog2.f32 %v459_v1 }
 0x2fd   : > { %629 = vlog2.f32 %v462_v2 }
 0x2ff   : > { %v465_v3 = vpop.xlane.xlu1 %464 }
 0x300   : > { %631 = vlog2.f32 %v465_v3 }
 0x302   : > { %v626_v4 = vpop.eup %625 }
 0x303   : > { %v467_v5 = vmul.f32 0.6931472, %v626_v4 }
 0x305   : > { %v474_v6 = vsub.f32 %v442_v47, %v467_v5 }
 0x306   : > { %v628_v7 = vpop.eup %627 }
 0x307   : > { %v630_v8 = vpop.eup %629  ;;  %478 = vst.msk [vmem:[%s226_s23] sm:$0xff] %vm429_vm2, %v474_v6  ;;  %v469_v9 = vmul.f32 0.6931472, %v628_v7 }
 0x308   : > { %v471_v10 = vmul.f32 0.6931472, %v630_v8 }
 0x309   : > { %v475_v11 = vsub.f32 %v443_v53, %v469_v9 }
 0x30a   : > { %v632_v12 = vpop.eup %631  ;;  %v476_v13 = vsub.f32 %v444_v45, %v471_v10 }
 0x30b   : > { %479 = vst.msk [vmem:[%s226_s23 + $0x8] sm:$0xff] %vm429_vm2, %v475_v11  ;;  %v473_v14 = vmul.f32 0.6931472, %v632_v12 }
 0x30c   : > { %480 = vst.msk [vmem:[%s226_s23 + $0x10] sm:$0xff] %vm429_vm2, %v476_v13 }
 0x30d   : > { %v477_v15 = vsub.f32 %v445_v51, %v473_v14 }
 0x30f   : > { %481 = vst.msk [vmem:[%s226_s23 + $0x18] sm:$0xff] %vm429_vm2, %v477_v15 }
 0x310 PF: > { %s15_s18 = sadd.s32 1, %s639_s18  }
 0x311   : > { %p12_p4 = scmp.ge.s32.totalorder %s15_s18, 4  }
 0x313   :  { %14 = sbr.rel (!%p12_p4) target bundleno = 1 (0x1), region = 70 }

</bundles_post_ra>
